<compile_context>
chip_gen: v7x
topology: tpu7x:2x2x1
jax: 0.10.0
libtpu: 0.0.40
codegen_flags: <defaults>
</compile_context>

<pallas_src>
import jax
import jax.numpy as jnp
from jax.experimental import pallas as pl
from jax.experimental.pallas import tpu as pltpu


def graph_learning_kernel(sum_lw_ref, yw_ref, yt_ref, adj_ref, out_ref):
    sum_lw = sum_lw_ref[0, 0]                  # scalar from SMEM

    # gram[i, j] = sum_d lw[d] * y[i, d] * y[j, d]   (plain NN matmul on the MXU:
    # lhs (TM, L) contracting dim 1 against stationary rhs (L, N) dim 0).
    gram = jax.lax.dot_general(
        yw_ref[...], yt_ref[...],
        dimension_numbers=(((1,), (0,)), ((), ())),
        preferred_element_type=jnp.float32)    # (TM, N)
    dist = sum_lw - gram

    # leaky_relu (PyTorch default negative_slope = 0.01): one mul + one max
    out = jnp.maximum(dist, 0.01 * dist)

    # masked, row-wise softmax-style normalization (full row is in this tile).
    out = out - jnp.max(out, axis=-1, keepdims=True)
    # Fold the adjacency mask in at the point of use; promotion (int8/bf16 -> f32)
    # happens per-strip instead of materializing a (TM, N) f32 copy up front.
    soft = jnp.exp(out) * adj_ref[...]
    s = jnp.sum(soft, axis=-1, keepdims=True)  # (TM, 1)
    # Rows with all-zero adj give s = 0 -> inf, matching the PyTorch reference
    # (the +1e-10 is added after the divide there too).
    inv_s = 1.0 / s
    out_ref[...] = (soft * inv_s + 1e-10).astype(out_ref.dtype)


def _vmem_budget_bytes():
    """(live row-slab budget, vmem_limit_bytes) derived from the part's VMEM."""
    try:
        cap = pltpu.get_tpu_info().vmem_capacity_bytes
    except Exception:
        cap = None
    if cap is None:
        # Unknown part: conservative sizing that works on every generation.
        return 32 * 1024 * 1024, 48 * 1024 * 1024
    if cap <= 64 * 1024 * 1024:
        # v7x-class (64 MiB / TensorCore): leave headroom for the resident yt
        # buffer, pipeline slack and compiler scratch.
        return 24 * 1024 * 1024, 40 * 1024 * 1024
    # v5e / v6e (128 MiB): big row tiles -> fewer grid steps, better DMA efficiency.
    return 72 * 1024 * 1024, 96 * 1024 * 1024


def _pick_block_rows(N, adj_itemsize, out_itemsize, budget):
    """Largest power-of-two row tile that (a) divides N, (b) keeps the live
    (TM, N) slabs under `budget`, preferring an even grid length (v7x megacore)."""
    # Live bytes per output row: ~3 f32 temps in the body + double-buffered
    # adj input + double-buffered out output.
    per_row = N * (3 * 4 + 2 * adj_itemsize + 2 * out_itemsize)
    cap = max(8, budget // per_row)
    best = None
    for t in (1024, 512, 256, 128, 64, 32, 16, 8):
        if t <= cap and N % t == 0 and t < N:
            if best is None:
                best = t
            if (N // t) % 2 == 0:              # even step count -> both v7x cores busy
                return t
    if best is not None:
        return best
    # TODO(synk): ragged / prime N needs a masked tail tile; single tile is only
    # safe for small N (asserted against the budget by the caller via VMEM limit).
    return N


def _resident_spec(shape):
    """BlockSpec for a block whose index never changes: single-buffer it."""
    index_map = lambda i: (0, 0)
    try:
        return pl.BlockSpec(shape, index_map, pipeline_mode=pl.Buffered(1))
    except (TypeError, ValueError):
        # TODO(synk): older jax without pipeline_mode -> default double buffering.
        return pl.BlockSpec(shape, index_map)


def graph_learning_forward(x, w_proj, learn_w, adj, *, block_rows=None,
                           out_dtype=jnp.float32):
    """x: (N, in_dim), w_proj: (learning_dim, in_dim) [PyTorch Linear layout],
    learn_w: (learning_dim,), adj: (N, N) 0/1 mask (f32 / bf16 / int8 all fine).
    Returns (soft_adj, None) -- eval path of GraphLearningLayer.forward.
    out_dtype=jnp.bfloat16 halves the HBM write (v5e lever) at ~1e-3 rel accuracy."""
    N, D = x.shape
    L = w_proj.shape[0]

    # Projection + row normalization + lw pre-scale once in XLA: O(N*L*D), tiny
    # vs the O(N^2) kernel work.  y rows have unit L2 norm, so the per-pair
    # denominator and its N^2 divide disappear from the kernel.
    x_hat = jnp.dot(x.astype(jnp.float32), w_proj.T.astype(jnp.float32))
    inv_n = jax.lax.rsqrt(jnp.sum(x_hat * x_hat, axis=-1, keepdims=True))
    y = x_hat * inv_n                                        # (N, L) unit-norm
    lw = learn_w.astype(jnp.float32)
    yw = y * lw[None, :]                                     # (N, L) row side, pre-scaled
    yt = y.T                                                 # (L, N) stationary, lane-dense
    sum_lw = jnp.sum(lw).reshape(1, 1)                       # SMEM scalar

    adj_itemsize = jnp.dtype(adj.dtype).itemsize
    out_itemsize = jnp.dtype(out_dtype).itemsize
    budget, vmem_limit = _vmem_budget_bytes()

    TM = block_rows if block_rows is not None else _pick_block_rows(
        N, adj_itemsize, out_itemsize, budget)
    assert N % TM == 0, f"block_rows={TM} must divide N={N}"
    grid = (N // TM,)

    soft_adj = pl.pallas_call(
        graph_learning_kernel,
        out_shape=jax.ShapeDtypeStruct((N, N), out_dtype),
        grid=grid,
        in_specs=[
            pl.BlockSpec(memory_space=pltpu.MemorySpace.SMEM),   # sum_lw (1,1)
            pl.BlockSpec((TM, L), lambda i: (i, 0)),             # pre-scaled rows of this tile
            _resident_spec((L, N)),                              # full y^T, DMA'd once, 1 buffer
            pl.BlockSpec((TM, N), lambda i: (i, 0)),             # adj row block (pipelined, narrow dtype)
        ],
        out_specs=pl.BlockSpec((TM, N), lambda i: (i, 0)),
        compiler_params=pltpu.CompilerParams(
            dimension_semantics=("parallel",),                   # megacore-shard rows (v7x)
            vmem_limit_bytes=vmem_limit,                         # generation-aware
        ),
    )(sum_lw, yw, yt, adj)

    # TODO(synk): _graph_learning_loss only runs in training mode (and its call
    # signature in the reference is inconsistent); eval path returns None loss.
    return soft_adj, None


def _reference(x, w_proj, learn_w, adj):
    """Direct JAX transcription of the PyTorch forward (eval path)."""
    x_hat = x @ w_proj.T
    N, L = x_hat.shape
    x_i = jnp.broadcast_to(x_hat[:, None, :], (N, N, L))
    x_j = jnp.broadcast_to(x_hat[None, :, :], (N, N, L))
    m1 = jnp.linalg.norm(x_i, axis=-1, keepdims=True)
    m2 = jnp.linalg.norm(x_j, axis=-1, keepdims=True)
    distance = 1.0 - (x_i * x_j) / (m1 * m2)
    dist = jnp.einsum("ijd,d->ij", distance, learn_w)
    out = jnp.where(dist >= 0, dist, 0.01 * dist)
    out = out - jnp.max(out, axis=-1, keepdims=True)
    soft = adj * jnp.exp(out)
    soft = soft / jnp.sum(soft, axis=-1, keepdims=True) + 1e-10
    return soft


if __name__ == "__main__":
    N, in_dim, learning_dim = 256, 16, 32      # small shapes; grid = (2,) row tiles
    gamma, eta = 0.5, 0.1                      # training-only loss hyperparams

    key = jax.random.PRNGKey(0)
    k_x, k_w, k_lw, k_adj = jax.random.split(key, 4)

    x = jax.random.normal(k_x, (N, in_dim), dtype=jnp.float32)
    # nn.Linear default-ish init (uniform +/- 1/sqrt(in_dim)), deterministic
    bound = 1.0 / (in_dim ** 0.5)
    w_proj = jax.random.uniform(k_w, (learning_dim, in_dim),
                                minval=-bound, maxval=bound, dtype=jnp.float32)
    # learn_w ~ U(0, 1) as in inint_parameters()
    learn_w = jax.random.uniform(k_lw, (learning_dim,), minval=0.0, maxval=1.0,
                                 dtype=jnp.float32)
    # random 0/1 adjacency with self-loops so row sums are nonzero
    adj_f32 = (jax.random.uniform(k_adj, (N, N)) > 0.5).astype(jnp.float32)
    adj_f32 = jnp.maximum(adj_f32, jnp.eye(N, dtype=jnp.float32))
    adj_i8 = adj_f32.astype(jnp.int8)          # 0/1 mask exact in int8; 1 B/elem HBM read

    soft_adj, gl_loss = graph_learning_forward(x, w_proj, learn_w, adj_i8)
    soft_adj = jax.block_until_ready(soft_adj)

    ref = _reference(x, w_proj, learn_w, adj_f32)
    assert soft_adj.shape == (N, N)
    assert gl_loss is None
    max_err = float(jnp.max(jnp.abs(soft_adj - ref)))
    assert jnp.allclose(soft_adj, ref, atol=1e-4, rtol=1e-4), (
        f"mismatch vs reference (max abs err {max_err:.3e})")
    print("KERNEL_OK")
</pallas_src>

<mosaic_0001>
module attributes {stable_mosaic.version = 11 : i64} {
  func.func @graph_learning_kernel(%arg0: i32, %arg1: memref<1x1xf32, #tpu.memory_space<smem>>, %arg2: memref<128x32xf32, #tpu.memory_space<vmem>>, %arg3: memref<32x256xf32, #tpu.memory_space<vmem>>, %arg4: memref<128x256xi8, #tpu.memory_space<vmem>>, %arg5: memref<128x256xf32, #tpu.memory_space<vmem>>) attributes {dimension_semantics = [#tpu.dimension_semantics<parallel>], iteration_bounds = array<i64: 2>, scalar_prefetch = 0 : i64, scratch_operands = 0 : i64, tpu.core_type = #tpu.core_type<tc>, window_params = [{transform_indices = @transform_0, window_bounds = array<i64: 1, 1>}, {transform_indices = @transform_1, window_bounds = array<i64: 128, 32>}, {pipeline_mode = #tpu.pipeline_mode<synchronous>, transform_indices = @transform_2, window_bounds = array<i64: 32, 256>}, {transform_indices = @transform_3, window_bounds = array<i64: 128, 256>}, {transform_indices = @transform_4, window_bounds = array<i64: 128, 256>}]} {
    %c0 = arith.constant 0 : index
    %c0_0 = arith.constant 0 : index
    %0 = memref.load %arg1[%c0, %c0_0] : memref<1x1xf32, #tpu.memory_space<smem>>
    %c0_1 = arith.constant 0 : index
    %c0_2 = arith.constant 0 : index
    %1 = vector.load %arg2[%c0_1, %c0_2] : memref<128x32xf32, #tpu.memory_space<vmem>>, vector<128x32xf32>
    %c0_3 = arith.constant 0 : index
    %c0_4 = arith.constant 0 : index
    %2 = vector.load %arg3[%c0_3, %c0_4] : memref<32x256xf32, #tpu.memory_space<vmem>>, vector<32x256xf32>
    %cst = arith.constant dense<0.000000e+00> : vector<128x256xf32>
    %3 = tpu.matmul %1, %2, %cst {dimension_numbers = #tpu.dot_dimension_numbers<[1], [0], [0], [1], [0, 0, 1, 1], [], []>} : vector<128x32xf32>, vector<32x256xf32>, vector<128x256xf32> -> vector<128x256xf32>
    %4 = vector.broadcast %0 : f32 to vector<128x256xf32>
    %5 = arith.subf %4, %3 : vector<128x256xf32>
    %cst_5 = arith.constant 0.00999999977 : f32
    %6 = vector.broadcast %cst_5 : f32 to vector<128x256xf32>
    %7 = arith.mulf %6, %5 : vector<128x256xf32>
    %8 = arith.maximumf %5, %7 : vector<128x256xf32>
    %cst_6 = arith.constant dense<0xFF800000> : vector<128xf32>
    %9 = vector.multi_reduction <maximumf>, %8, %cst_6 [1] : vector<128x256xf32> to vector<128xf32>
    %10 = vector.shape_cast %9 : vector<128xf32> to vector<128x1xf32>
    %11 = vector.broadcast %10 : vector<128x1xf32> to vector<128x256xf32>
    %12 = arith.subf %8, %11 : vector<128x256xf32>
    %13 = math.exp %12 : vector<128x256xf32>
    %c0_7 = arith.constant 0 : index
    %c0_8 = arith.constant 0 : index
    %14 = vector.load %arg4[%c0_7, %c0_8] : memref<128x256xi8, #tpu.memory_space<vmem>>, vector<128x256xi8>
    %15 = arith.sitofp %14 : vector<128x256xi8> to vector<128x256xf32>
    %16 = arith.mulf %13, %15 : vector<128x256xf32>
    %cst_9 = arith.constant dense<0.000000e+00> : vector<128xf32>
    %17 = vector.multi_reduction <add>, %16, %cst_9 [1] : vector<128x256xf32> to vector<128xf32>
    %18 = vector.shape_cast %17 : vector<128xf32> to vector<128x1xf32>
    %cst_10 = arith.constant 1.000000e+00 : f32
    %19 = vector.broadcast %cst_10 : f32 to vector<128x1xf32>
    %20 = arith.divf %19, %18 : vector<128x1xf32>
    %21 = vector.broadcast %20 : vector<128x1xf32> to vector<128x256xf32>
    %22 = arith.mulf %16, %21 : vector<128x256xf32>
    %cst_11 = arith.constant 1.000000e-10 : f32
    %23 = vector.broadcast %cst_11 : f32 to vector<128x256xf32>
    %24 = arith.addf %22, %23 : vector<128x256xf32>
    %c0_12 = arith.constant 0 : index
    %c0_13 = arith.constant 0 : index
    %25 = vector.load %arg5[%c0_12, %c0_13] : memref<128x256xf32, #tpu.memory_space<vmem>>, vector<128x256xf32>
    tpu.vector_store %arg5[%c0_12, %c0_13], %24 {strides = array<i32>} : memref<128x256xf32, #tpu.memory_space<vmem>>, vector<128x256xf32>,
    return
  }
  func.func @transform_0(%arg0: i32) -> (i32, i32) {
    %c0_i32 = arith.constant 0 : i32
    %c0_i32_0 = arith.constant 0 : i32
    %c0_i32_1 = arith.constant 0 : i32
    return %c0_i32, %c0_i32_0 : i32, i32
  }
  func.func @transform_1(%arg0: i32) -> (i32, i32) {
    %c0_i32 = arith.constant 0 : i32
    %c0_i32_0 = arith.constant 0 : i32
    return %arg0, %c0_i32 : i32, i32
  }
  func.func @transform_2(%arg0: i32) -> (i32, i32) {
    %c0_i32 = arith.constant 0 : i32
    %c0_i32_0 = arith.constant 0 : i32
    %c0_i32_1 = arith.constant 0 : i32
    return %c0_i32, %c0_i32_0 : i32, i32
  }
  func.func @transform_3(%arg0: i32) -> (i32, i32) {
    %c0_i32 = arith.constant 0 : i32
    %c0_i32_0 = arith.constant 0 : i32
    return %arg0, %c0_i32 : i32, i32
  }
  func.func @transform_4(%arg0: i32) -> (i32, i32) {
    %c0_i32 = arith.constant 0 : i32
    %c0_i32_0 = arith.constant 0 : i32
    return %arg0, %c0_i32 : i32, i32
  }
}

</mosaic_0001>

<bundles_post_ra>
// kernel: tpu_custom_call.1
= control target key start
LH: loop header
LB: loop body
LE: loop exit
PB: predicated region body
PF: predicated region fallthrough
CT: control target
= control target key end

     0   :  { %s1950_s0 = inlined_call_operand.<no memory space> [shape: f32[1,1], index: 0, kind: input, shape index: {}]   ;;  %s1951_s1 = inlined_call_operand.vmem [shape: f32[256,32], index: 1, kind: input, shape index: {}]   ;;  %s1952_s2 = inlined_call_operand.vmem [shape: f32[32,256], index: 2, kind: input, shape index: {}]   ;;  %s1953_s3 = inlined_call_operand.vmem [shape: s8[256,256], index: 3, kind: input, shape index: {}]   ;;  %s1954_s4 = inlined_call_operand.hbm [shape: f32[256,256], index: 4, kind: output, shape index: {}]  }
   0x1   :  { %9 = sst [smem:[#allocation2]] %s1950_s0 }
   0x2   :  { %10 = vsyncpa [#allocation4], 0 }
   0x3   :  { %12 = vsyncpa [#allocation4 + $0x1], 0  ;;  %s1351_s17 = smov 0   ;;  %s1353_s18 = smov 0  }
   0x4   :  { %s1355_s19 = smov 0   ;;  %s1357_s20 = smov 0  }
   0x5 LB: > { %s1372_s0 = sadd.s32 4294967295, %s1317_s20   ;;  %s1070_s21 = sadd.s32 4294967294, %s1317_s20   ;;  %s1317_s20 = sphi %s1357_s20, %s1972_s20   ;;  %s1313_s19 = sphi %s1355_s19, %s1971_s19   ;;  %s1309_s18 = sphi %s1353_s18, %s1970_s18   ;;  %s1305_s17 = sphi %s1351_s17, %s1969_s17  }
   0x6   : > { %s1376_s22 = sadd.s32 1, %s1317_s20   ;;  %s119_s23 = sadd.s32 1, %s1313_s19 }
   0x7   : > { %s116_s24 = ssub.s32 %s1317_s20, %s1376_s22  ;;  %p129_p0 = scmp.ne.s32.totalorder %s1313_s19, %s1309_s18 }
   0x8   : > { %p117_p1 = scmp.eq.s32.totalorder %s116_s24, 0  ;;  %p130_p2 = scmp.eq.s32.totalorder %s1372_s0, 1 }
   0x9   : > { %p135_p3 = scmp.ne.s32.totalorder %s1309_s18, %s1305_s17  ;;  %p136_p4 = scmp.eq.s32.totalorder %s1070_s21, 1 }
   0xa   : > { %s1387_s25 = scalar_select %p117_p1, %s1313_s19, %s119_s23  }
   0xb   : > { %p1389_p5 = por %p130_p2, %p129_p0  ;;  %p1393_p6 = por %p136_p4, %p135_p3 }
   0xc   : > { %p1073_p7 = scmp.ge.s32.totalorder %s1317_s20, 1  ;;  %p179_p8 = scmp.lt.s32.totalorder %s1317_s20, 3 }
   0xe   : > { %p180_p9 = pnand %p1073_p7, %p179_p8 }
  0x10   : > { %183 = sbr.rel (%p180_p9) target bundleno = 628 (0x274), region = 36 }
  0x17   : > { %v243_v0 = vld [vmem:[%s1952_s2 + $0x8] sm:$0xff]  ;;  %v245_v1 = vld [vmem:[%s1952_s2 + $0x18] sm:$0xff]  ;;  %v242_v2 = vld [vmem:[%s1952_s2] sm:$0xff]  ;;  %s1075_s8 = sshll.u32 %s1372_s0, 4  ;;  %v1319_v7 = vmov 0.0   ;;  %vm250_vm0 = vcmask 261120  }
  0x18   : > { %v1105_v3 = vpack.c.bf16 %v245_v1, %v243_v0  ;;  %v244_v4 = vld [vmem:[%s1952_s2 + $0x10] sm:$0xff]  ;;  %v247_v5 = vld [vmem:[%s1952_s2 + $0x28] sm:$0xff]  ;;  %v249_v6 = vld [vmem:[%s1952_s2 + $0x38] sm:$0xff]  ;;  %363 = vmatprep.mubr.f32.mxu0 %v1319_v7  ;;  %411 = vmatprep.mubr.f32.mxu1 %v1319_v7  ;;  %p212_p10 = scmp.lt.s32.totalorder %s1075_s8, 31  ;;  %s225_s5 = sld [smem:[#allocation2]] }
  0x19   : > { %v1107_v8 = vpack.c.bf16 %v244_v4, %v242_v2  ;;  %v1109_v9 = vpack.c.bf16 %v249_v6, %v247_v5  ;;  %v246_v10 = vld [vmem:[%s1952_s2 + $0x20] sm:$0xff]  ;;  %v248_v11 = vld [vmem:[%s1952_s2 + $0x30] sm:$0xff]  ;;  %s1077_s6 = sshll.u32 %s1372_s0, 2  ;;  %s208_s11 = sand.u32 1, %s1309_s18  }
  0x1a   : > { %1106 = vmatprep.subr.bf16.mxu0 %v1105_v3  ;;  %1113 = vmatprep.subr.bf16.mxu1 %v1105_v3  ;;  %s1974_s8 = smov (!%p212_p10, %s1075_s8), 31  ;;  %v1111_v12 = vpack.c.bf16 %v248_v11, %v246_v10  ;;  %p218_p11 = scmp.lt.s32.totalorder %s1077_s6, 7 }
  0x1b   : > { %1108 = vmatpush1.bf16.msra.mxu0 %v1107_v8  ;;  %1115 = vmatpush1.bf16.msra.mxu1 %v1107_v8  ;;  %s1076_s24 = sshll.u32 %s1974_s8, 3  ;;  %s1074_s12 = sshll.u32 %s208_s11, 8 }
  0x1c   : > { %1110 = vmatprep.subr.bf16.mxu0 %v1109_v9  ;;  %1114 = vmatprep.subr.bf16.mxu1 %v1109_v9  ;;  %s1427_s30 = scalar_lea.vmem %s1951_s1, %s1076_s24  ;;  %s1976_s6 = smov (!%p218_p11, %s1077_s6), 7 }
  0x1d   : > { %v226_v13 = vld [vmem:[%s1427_s30] sm:$0xff]  ;;  %v227_v15 = vld [vmem:[%s1427_s30 + $0x8] sm:$0xff]  ;;  %v228_v17 = vld [vmem:[%s1427_s30 + $0x10] sm:$0xff]  ;;  %s1102_s7 = sshll.u32 %s1976_s6, 4  ;;  %s1834_s13 = scalar_lea.vmem [#allocation3], %s1074_s12 }
  0x1e   : > { %v234_v14 = vld [vmem:[%s1427_s30 + $0x40] sm:$0xff]  ;;  %v235_v16 = vld [vmem:[%s1427_s30 + $0x48] sm:$0xff]  ;;  %v236_v18 = vld [vmem:[%s1427_s30 + $0x50] sm:$0xff]  ;;  %v1461_v29 = vstv %s225_s5  ;;  %s1595_s10 = scalar_lea.vmem %s1953_s3, %s1102_s7  ;;  %s1104_s14 = sshll.u32 %s1372_s0, 12 }
  0x1f   : > { %1112 = vmatpush1.bf16.msra.mxu0 %v1111_v12  ;;  %1116 = vmatpush1.bf16.msra.mxu1 %v1111_v12  ;;  %v229_v19 = vld [vmem:[%s1427_s30 + $0x18] sm:$0xff]  ;;  %v230_v21 = vld [vmem:[%s1427_s30 + $0x20] sm:$0xff]  ;;  %v231_v23 = vld [vmem:[%s1427_s30 + $0x28] sm:$0xff]  ;;  %s996_s15 = sshll.u32 %s1834_s13, 4  ;;  %s1901_s23 = scalar_lea.hbm %s1954_s4, %s1104_s14  ;;  %s1903_s15 = int_to_ptr.vmem [resolvable:$true] %s996_s15 }
  0x20   : > { %v237_v20 = vld [vmem:[%s1427_s30 + $0x58] sm:$0xff]  ;;  %v238_v22 = vld [vmem:[%s1427_s30 + $0x60] sm:$0xff]  ;;  %v239_v24 = vld [vmem:[%s1427_s30 + $0x68] sm:$0xff]  ;;  %s1909_s0 = scalar_lea.sflag [#allocation4], %s208_s11  ;;  %s1255_s24 = scalar_lea.vmem %s1903_s15, 4096 }
  0x21   : > { %v232_v25 = vld [vmem:[%s1427_s30 + $0x30] sm:$0xff]  ;;  %v233_v27 = vld [vmem:[%s1427_s30 + $0x38] sm:$0xff]  ;;  %p1256_p12 = scmp.ne.s32.totalorder %s1903_s15, %s1255_s24  ;;  %s1320_s28 = smov [#allocation3]  }
  0x22   : > { %1080 = vmatmul.mubr.msk.f32.vlgmr.msra.gmra.mrb[0].mxu0 %vm250_vm0, %v226_v13  ;;  %1088 = vmatmul.mubr.msk.f32.vlgmr.msra.gmra.mrb[0].mxu1 %vm250_vm0, %v234_v14  ;;  %v240_v26 = vld [vmem:[%s1427_s30 + $0x70] sm:$0xff]  ;;  %v241_v28 = vld [vmem:[%s1427_s30 + $0x78] sm:$0xff]  ;;  %s1259_s29 = sshll.u32 %s1320_s28, 4  ;;  %s1260_s29 = int_to_ptr.vmem [resolvable:$false] %s1259_s29 }
  0x23   : > { %369 = vmatprep.mubr.f32.mxu0 %v1319_v7  ;;  %417 = vmatprep.mubr.f32.mxu1 %v1319_v7  ;;  %p1257_p13 = pnand %p1256_p12, %p1389_p5  ;;  %s1261_s30 = scalar_lea.vmem %s1260_s29, 8192 }
  0x24   : > { %p1262_p1 = scmp.lt.s32.totalorder %s1903_s15, %s1260_s29  ;;  %p1263_p2 = scmp.lt.s32.totalorder %s1261_s30, %s1255_s24 }
  0x25   : > { %p1258_p0 = pneg %p1257_p13 }
  0x26   : > { %1081 = vmatmul.mubr.msk.f32.gmra.mrb[2].mxu0 %vm250_vm0, %v227_v15  ;;  %1089 = vmatmul.mubr.msk.f32.gmra.mrb[2].mxu1 %vm250_vm0, %v235_v16  ;;  %p1264_p3 = por %p1263_p2, %p1262_p1 }
  0x27   : > { %375 = vmatprep.mubr.f32.mxu0 %v1319_v7  ;;  %423 = vmatprep.mubr.f32.mxu1 %v1319_v7 }
  0x28   : > { %p1265_p4 = pnand %p1264_p3, %p1258_p0 }
  0x2a   : > { %1082 = vmatmul.mubr.msk.f32.gmra.mrb[4].mxu0 %vm250_vm0, %v228_v17  ;;  %1090 = vmatmul.mubr.msk.f32.gmra.mrb[4].mxu1 %vm250_vm0, %v236_v18 }
  0x2b   : > { %381 = vmatprep.mubr.f32.mxu0 %v1319_v7  ;;  %429 = vmatprep.mubr.f32.mxu1 %v1319_v7 }
  0x2e   : > { %1083 = vmatmul.mubr.msk.f32.gmra.mrb[6].mxu0 %vm250_vm0, %v229_v19  ;;  %1091 = vmatmul.mubr.msk.f32.gmra.mrb[6].mxu1 %vm250_vm0, %v237_v20 }
  0x2f   : > { %387 = vmatprep.mubr.f32.mxu0 %v1319_v7  ;;  %435 = vmatprep.mubr.f32.mxu1 %v1319_v7 }
  0x32   : > { %1084 = vmatmul.mubr.msk.f32.gmra.mrb[8].mxu0 %vm250_vm0, %v230_v21  ;;  %1092 = vmatmul.mubr.msk.f32.gmra.mrb[8].mxu1 %vm250_vm0, %v238_v22 }
  0x33   : > { %393 = vmatprep.mubr.f32.mxu0 %v1319_v7  ;;  %441 = vmatprep.mubr.f32.mxu1 %v1319_v7 }
  0x36   : > { %1085 = vmatmul.mubr.msk.f32.gmra.mrb[10].mxu0 %vm250_vm0, %v231_v23  ;;  %1093 = vmatmul.mubr.msk.f32.gmra.mrb[10].mxu1 %vm250_vm0, %v239_v24 }
  0x37   : > { %399 = vmatprep.mubr.f32.mxu0 %v1319_v7  ;;  %447 = vmatprep.mubr.f32.mxu1 %v1319_v7 }
  0x3a   : > { %1086 = vmatmul.mubr.msk.f32.gmra.mrb[12].mxu0 %vm250_vm0, %v232_v25  ;;  %1094 = vmatmul.mubr.msk.f32.gmra.mrb[12].mxu1 %vm250_vm0, %v240_v26 }
  0x3b   : > { %405 = vmatprep.mubr.f32.mxu0 %v1319_v7  ;;  %453 = vmatprep.mubr.f32.mxu1 %v1319_v7 }
  0x3e   : > { %1087 = vmatmul.mubr.msk.f32.gmra.mrb[14].mxu0 %vm250_vm0, %v233_v27  ;;  %1095 = vmatmul.mubr.msk.f32.gmra.mrb[14].mxu1 %vm250_vm0, %v241_v28 }
  0xf5   : > { %v365_v30 = vpop.f32.mrb[0].mxu0  ;;  %v413_v31 = vpop.f32.mrb[0].mxu1 }
  0xf6   : > { %v461_v32 = vsub.f32 %v1461_v29, %v365_v30  ;;  %v367_v33 = vpop.f32.mrb[1].mxu0  ;;  %v477_v34 = vsub.f32 %v1461_v29, %v413_v31  ;;  %v415_v35 = vpop.f32.mrb[1].mxu1 }
  0xf7   : > { %v462_v36 = vsub.f32 %v1461_v29, %v367_v33  ;;  %v478_v37 = vsub.f32 %v1461_v29, %v415_v35 }
  0xf8   : > { %v493_v38 = vmul.f32 0.01, %v461_v32  ;;  %v509_v39 = vmul.f32 0.01, %v477_v34 }
  0xf9   : > { %v494_v40 = vmul.f32 0.01, %v462_v36  ;;  %v510_v41 = vmul.f32 0.01, %v478_v37  ;;  %v419_v42 = vpop.f32.mrb[2].mxu1  ;;  %v371_v43 = vpop.f32.mrb[2].mxu0 }
  0xfa   : > { %v479_v44 = vsub.f32 %v1461_v29, %v419_v42  ;;  %v463_v45 = vsub.f32 %v1461_v29, %v371_v43  ;;  %v421_v46 = vpop.f32.mrb[3].mxu1  ;;  %v373_v47 = vpop.f32.mrb[3].mxu0  ;;  %v1469_v48 = vmax.f32 %v461_v32, %v493_v38  ;;  %v1475_v52 = vmax.f32 %v477_v34, %v509_v39 }
  0xfb   : > { %v480_v49 = vsub.f32 %v1461_v29, %v421_v46  ;;  %v464_v50 = vsub.f32 %v1461_v29, %v373_v47  ;;  %v1473_v51 = vmax.f32 %v462_v36, %v494_v40  ;;  %v1477_v53 = vmax.f32 %v478_v37, %v510_v41 }
  0xfc   : > { %v511_v54 = vmul.f32 0.01, %v479_v44  ;;  %v495_v55 = vmul.f32 0.01, %v463_v45 }
  0xfd   : > { %v512_v56 = vmul.f32 0.01, %v480_v49  ;;  %v496_v57 = vmul.f32 0.01, %v464_v50  ;;  %v377_v58 = vpop.f32.mrb[4].mxu0  ;;  %v557_v59 = vmax.f32 %v1469_v48, %v1473_v51  ;;  %v425_v60 = vpop.f32.mrb[4].mxu1  ;;  %v581_v8 = vmax.f32 %v1475_v52, %v1477_v53 }
  0xfe   : > { %v465_v61 = vsub.f32 %v1461_v29, %v377_v58  ;;  %v379_v62 = vpop.f32.mrb[5].mxu0  ;;  %v481_v63 = vsub.f32 %v1461_v29, %v425_v60  ;;  %v427_v0 = vpop.f32.mrb[5].mxu1  ;;  %v1483_v1 = vmax.f32 %v479_v44, %v511_v54  ;;  %v1489_v5 = vmax.f32 %v463_v45, %v495_v55 }
  0xff   : > { %v466_v2 = vsub.f32 %v1461_v29, %v379_v62  ;;  %558 = vmax.xlane.f32.xlu0 %v557_v59  ;;  %v482_v3 = vsub.f32 %v1461_v29, %v427_v0  ;;  %v1487_v4 = vmax.f32 %v480_v49, %v512_v56  ;;  %v1493_v9 = vmax.f32 %v464_v50, %v496_v57 }
 0x100   : > { %v497_v6 = vmul.f32 0.01, %v465_v61  ;;  %v513_v7 = vmul.f32 0.01, %v481_v63 }
 0x101   : > { %v498_v10 = vmul.f32 0.01, %v466_v2  ;;  %v383_v11 = vpop.f32.mrb[6].mxu0  ;;  %v514_v12 = vmul.f32 0.01, %v482_v3  ;;  %v584_v13 = vmax.f32 %v1483_v1, %v1487_v4  ;;  %v431_v14 = vpop.f32.mrb[6].mxu1  ;;  %v560_v30 = vmax.f32 %v1489_v5, %v1493_v9 }
 0x102   : > { %v1497_v15 = vmax.f32 %v465_v61, %v497_v6  ;;  %v467_v16 = vsub.f32 %v1461_v29, %v383_v11  ;;  %v1500_v17 = vmax.f32 %v481_v63, %v513_v7  ;;  %v385_v18 = vpop.f32.mrb[7].mxu0  ;;  %v483_v19 = vsub.f32 %v1461_v29, %v431_v14  ;;  %v433_v20 = vpop.f32.mrb[7].mxu1 }
 0x103   : > { %v1503_v21 = vmax.f32 %v466_v2, %v498_v10  ;;  %v468_v22 = vsub.f32 %v1461_v29, %v385_v18  ;;  %v1506_v23 = vmax.f32 %v482_v3, %v514_v12  ;;  %585 = vmax.xlane.f32.xlu1 %v584_v13  ;;  %582 = vmax.xlane.f32.xlu0 %v581_v8 }
 0x104   : > { %v499_v24 = vmul.f32 0.01, %v467_v16  ;;  %v515_v25 = vmul.f32 0.01, %v483_v19  ;;  %v484_v26 = vsub.f32 %v1461_v29, %v433_v20 }
 0x105   : > { %v500_v27 = vmul.f32 0.01, %v468_v22  ;;  %v389_v28 = vpop.f32.mrb[8].mxu0  ;;  %v563_v31 = vmax.f32 %v1497_v15, %v1503_v21  ;;  %v437_v32 = vpop.f32.mrb[8].mxu1  ;;  %v587_v38 = vmax.f32 %v1500_v17, %v1506_v23 }
 0x106   : > { %v1513_v33 = vmax.f32 %v467_v16, %v499_v24  ;;  %v469_v34 = vsub.f32 %v1461_v29, %v389_v28  ;;  %v391_v35 = vpop.f32.mrb[9].mxu0  ;;  %v516_v36 = vmul.f32 0.01, %v484_v26  ;;  %v439_v37 = vpop.f32.mrb[9].mxu1  ;;  %v485_v41 = vsub.f32 %v1461_v29, %v437_v32 }
 0x107   : > { %v1518_v39 = vmax.f32 %v468_v22, %v500_v27  ;;  %v470_v40 = vsub.f32 %v1461_v29, %v391_v35  ;;  %561 = vmax.xlane.f32.xlu0 %v560_v30  ;;  %564 = vmax.xlane.f32.xlu1 %v563_v31  ;;  %v1522_v43 = vmax.f32 %v483_v19, %v515_v25 }
 0x108   : > { %v501_v42 = vmul.f32 0.01, %v469_v34  ;;  %v486_v44 = vsub.f32 %v1461_v29, %v439_v37  ;;  %v1525_v46 = vmax.f32 %v484_v26, %v516_v36  ;;  %v517_v49 = vmul.f32 0.01, %v485_v41 }
 0x109   : > { %v502_v45 = vmul.f32 0.01, %v470_v40  ;;  %v395_v47 = vpop.f32.mrb[10].mxu0  ;;  %v566_v50 = vmax.f32 %v1513_v33, %v1518_v39  ;;  %v443_v54 = vpop.f32.mrb[10].mxu1 }
 0x10a   : > { %v1529_v55 = vmax.f32 %v469_v34, %v501_v42  ;;  %v471_v56 = vsub.f32 %v1461_v29, %v395_v47  ;;  %v397_v57 = vpop.f32.mrb[11].mxu0  ;;  %v518_v58 = vmul.f32 0.01, %v486_v44  ;;  %v487_v59 = vsub.f32 %v1461_v29, %v443_v54  ;;  %v445_v60 = vpop.f32.mrb[11].mxu1 }
 0x10b   : > { %v1533_v61 = vmax.f32 %v470_v40, %v502_v45  ;;  %v1535_v62 = vmax.f32 %v485_v41, %v517_v49  ;;  %v472_v63 = vsub.f32 %v1461_v29, %v397_v57  ;;  %588 = vmax.xlane.f32.xlu0 %v587_v38  ;;  %567 = vmax.xlane.f32.xlu1 %v566_v50 }
 0x10c   : > { %v503_v0 = vmul.f32 0.01, %v471_v56  ;;  %v1538_v2 = vmax.f32 %v486_v44, %v518_v58  ;;  %v519_v3 = vmul.f32 0.01, %v487_v59  ;;  %v488_v6 = vsub.f32 %v1461_v29, %v445_v60 }
 0x10d   : > { %v504_v7 = vmul.f32 0.01, %v472_v63  ;;  %v401_v8 = vpop.f32.mrb[12].mxu0  ;;  %v590_v10 = vmax.f32 %v1522_v43, %v1525_v46  ;;  %v569_v11 = vmax.f32 %v1529_v55, %v1533_v61  ;;  %v449_v12 = vpop.f32.mrb[12].mxu1 }
 0x10e   : > { %v1545_v13 = vmax.f32 %v471_v56, %v503_v0  ;;  %v473_v14 = vsub.f32 %v1461_v29, %v401_v8  ;;  %v403_v16 = vpop.f32.mrb[13].mxu0  ;;  %v520_v18 = vmul.f32 0.01, %v488_v6  ;;  %v451_v19 = vpop.f32.mrb[13].mxu1  ;;  %v489_v24 = vsub.f32 %v1461_v29, %v449_v12  ;;  %v702_v12 = vld [vmem:[%s1595_s10 + $0x8] sm:$0xff] }
 0x10f   : > { %v1548_v20 = vmax.f32 %v472_v63, %v504_v7  ;;  %v474_v22 = vsub.f32 %v1461_v29, %v403_v16  ;;  %591 = vmax.xlane.f32.xlu1 %v590_v10  ;;  %570 = vmax.xlane.f32.xlu0 %v569_v11  ;;  %v1552_v26 = vmax.f32 %v487_v59, %v519_v3  ;;  %v701_v11 = vld [vmem:[%s1595_s10] sm:$0xff]  ;;  %v706_v16 = vld [vmem:[%s1595_s10 + $0x28] sm:$0xff] }
 0x110   : > { %v505_v25 = vmul.f32 0.01, %v473_v14  ;;  %v490_v27 = vsub.f32 %v1461_v29, %v451_v19  ;;  %v593_v28 = vmax.f32 %v1535_v62, %v1538_v2  ;;  %v1557_v31 = vmax.f32 %v488_v6, %v520_v18 }
 0x111   : > { %v506_v30 = vmul.f32 0.01, %v474_v22  ;;  %v407_v32 = vpop.f32.mrb[14].mxu0  ;;  %v521_v34 = vmul.f32 0.01, %v489_v24  ;;  %v572_v35 = vmax.f32 %v1545_v13, %v1548_v20  ;;  %v455_v36 = vpop.f32.mrb[14].mxu1  ;;  %v709_v18 = vunpack.c.0.s8 %v701_v11 }
 0x112   : > { %v1561_v37 = vmax.f32 %v473_v14, %v505_v25  ;;  %v475_v38 = vsub.f32 %v1461_v29, %v407_v32  ;;  %v409_v40 = vpop.f32.mrb[15].mxu0  ;;  %v522_v41 = vmul.f32 0.01, %v490_v27  ;;  %v491_v42 = vsub.f32 %v1461_v29, %v455_v36  ;;  %v457_v44 = vpop.f32.mrb[15].mxu1  ;;  %v705_v14 = vld [vmem:[%s1595_s10 + $0x20] sm:$0xff] }
 0x113   : > { %v1565_v45 = vmax.f32 %v474_v22, %v506_v30  ;;  %v1567_v47 = vmax.f32 %v489_v24, %v521_v34  ;;  %v476_v49 = vsub.f32 %v1461_v29, %v409_v40  ;;  %594 = vmax.xlane.f32.xlu0 %v593_v28  ;;  %573 = vmax.xlane.f32.xlu1 %v572_v35  ;;  %v710_v19 = vunpack.c.0.s8 %v702_v12 }
 0x114   : > { %v507_v50 = vmul.f32 0.01, %v475_v38  ;;  %v1570_v54 = vmax.f32 %v490_v27, %v522_v41  ;;  %v523_v56 = vmul.f32 0.01, %v491_v42  ;;  %v492_v57 = vsub.f32 %v1461_v29, %v457_v44  ;;  %v1610_v44 = vld [vmem:[%s1595_s10 + $0x10] sm:$0xff] }
 0x115   : > { %v508_v58 = vmul.f32 0.01, %v476_v49  ;;  %v596_v59 = vmax.f32 %v1552_v26, %v1557_v31  ;;  %v575_v60 = vmax.f32 %v1561_v37, %v1565_v45  ;;  %v725_v22 = vunpack.c.0.s8 %v705_v14 }
 0x116   : > { %v1577_v63 = vmax.f32 %v475_v38, %v507_v50  ;;  %v524_v0 = vmul.f32 0.01, %v492_v57  ;;  %v1581_v6 = vmax.f32 %v491_v42, %v523_v56  ;;  %v599_v29 = vmax.f32 %v1567_v47, %v1570_v54 }
 0x117   : > { %v1579_v3 = vmax.f32 %v476_v49, %v508_v58  ;;  %597 = vmax.xlane.f32.xlu1 %v596_v59  ;;  %576 = vmax.xlane.f32.xlu0 %v575_v60  ;;  %v726_v24 = vunpack.c.0.s8 %v706_v16  ;;  %v713_v25 = vunpack.c.2.s8 %v701_v11  ;;  %v727_v27 = vunpack.c.1.s8 %v705_v14  ;;  %v1619_v59 = vld [vmem:[%s1595_s10 + $0x18] sm:$0xff] }
 0x118   : > { %1959 = vst [vmem:[#allocation6_spill] sm:$0xff] %v1581_v6  ;;  %v1585_v7 = vmax.f32 %v492_v57, %v524_v0  ;;  %v728_v28 = vunpack.c.1.s8 %v706_v16  ;;  %v714_v30 = vunpack.c.2.s8 %v702_v12  ;;  %v711_v32 = vunpack.c.1.s8 %v701_v11 }
 0x119   : > { %v578_v8 = vmax.f32 %v1577_v63, %v1579_v3  ;;  %v1601_v34 = vcvt.s32.f32 %v709_v18  ;;  %v712_v35 = vunpack.c.1.s8 %v702_v12  ;;  %v729_v36 = vunpack.c.2.s8 %v705_v14 }
 0x11a   : > { %1960 = vst [vmem:[#allocation7_spill] sm:$0xff] %v1585_v7  ;;  %v602_v10 = vmax.f32 %v1581_v6, %v1585_v7  ;;  %v730_v38 = vunpack.c.2.s8 %v706_v16  ;;  %v1603_v40 = vcvt.s32.f32 %v710_v19  ;;  %v1605_v41 = vcvt.s32.f32 %v725_v22 }
 0x11b   : > { %600 = vmax.xlane.f32.xlu0 %v599_v29  ;;  %579 = vmax.xlane.f32.xlu1 %v578_v8  ;;  %v1607_v42 = vcvt.s32.f32 %v726_v24  ;;  %v715_v49 = vunpack.c.3.s8 %v701_v11  ;;  %v1612_v56 = vcvt.s32.f32 %v713_v25  ;;  %v1614_v57 = vcvt.s32.f32 %v727_v27  ;;  %v1628_v11 = vld [vmem:[%s1595_s10 + $0x30] sm:$0xff] }
 0x11c   : > { %v1616_v58 = vcvt.s32.f32 %v728_v28  ;;  %v716_v60 = vunpack.c.3.s8 %v702_v12  ;;  %v1623_v8 = vcvt.s32.f32 %v714_v30  ;;  %v1630_v18 = vcvt.s32.f32 %v712_v35 }
 0x11d   : > { %v1632_v19 = vcvt.s32.f32 %v729_v36  ;;  %v1634_v22 = vcvt.s32.f32 %v730_v38  ;;  %v717_v24 = vunpack.c.0.s8 %v1610_v44  ;;  %v1638_v27 = vcvt.s32.f32 %v715_v49 }
 0x11e   : > { %v733_v35 = vunpack.c.0.s8 %v1628_v11  ;;  %v731_v36 = vunpack.c.3.s8 %v705_v14 }
 0x11f   : > { %603 = vmax.xlane.f32.xlu1 %v602_v10  ;;  %v1625_v10 = vcvt.s32.f32 %v711_v32  ;;  %1961 = vst [vmem:[#allocation8_spill] sm:$0xff] %v1634_v22  ;;  %1962 = vst [vmem:[#allocation9_spill] sm:$0xff] %v1638_v27  ;;  %v1643_v32 = vcvt.s32.f32 %v716_v60  ;;  %v1650_v27 = vcvt.s32.f32 %v717_v24 }
 0x121   : > { %1963 = vst [vmem:[#allocation10_spill] sm:$0xff] %v1643_v32 }
 0x18c   : > { %v559_v50 = vpop.xlane.xlu0 %558 }
 0x18d   : > { %v605_v0 = vsub.f32 %v1469_v48, %v559_v50  ;;  %v606_v29 = vsub.f32 %v1473_v51, %v559_v50  ;;  %v718_v48 = vunpack.c.0.s8 %v1619_v59  ;;  %v1641_v51 = vld [vmem:[%s1595_s10 + $0x38] sm:$0xff]  ;;  %v732_v50 = vunpack.c.3.s8 %v706_v16 }
 0x18e   : > { %v734_v7 = vunpack.c.0.s8 %v1641_v51 }
 0x18f   : > { %v637_v25 = vmul.f32 1.442695, %v605_v0  ;;  %v639_v12 = vmul.f32 1.442695, %v606_v29  ;;  %v1653_v22 = vcvt.s32.f32 %v718_v48 }
 0x190   : > { %v586_v28 = vpop.xlane.xlu1 %585  ;;  %v583_v30 = vpop.xlane.xlu0 %582 }
 0x191   : > { %1159 = vpow2.f32 %v637_v25  ;;  %v623_v38 = vsub.f32 %v1483_v1, %v586_v28  ;;  %v624_v0 = vsub.f32 %v1487_v4, %v586_v28  ;;  %v621_v29 = vsub.f32 %v1475_v52, %v583_v30 }
 0x192   : > { %1161 = vpow2.f32 %v639_v12  ;;  %v622_v49 = vsub.f32 %v1477_v53, %v583_v30  ;;  %v1655_v1 = vcvt.s32.f32 %v733_v35  ;;  %v1657_v4 = vcvt.s32.f32 %v731_v36 }
 0x193   : > { %v673_v60 = vmul.f32 1.442695, %v623_v38  ;;  %v675_v32 = vmul.f32 1.442695, %v624_v0  ;;  %v669_v6 = vmul.f32 1.442695, %v621_v29  ;;  %v1659_v52 = vcvt.s32.f32 %v732_v50 }
 0x194   : > { %v671_v14 = vmul.f32 1.442695, %v622_v49  ;;  %v562_v16 = vpop.xlane.xlu0 %561  ;;  %v565_v25 = vpop.xlane.xlu1 %564  ;;  %v1665_v28 = vcvt.s32.f32 %v734_v7  ;;  %v719_v30 = vunpack.c.1.s8 %v1610_v44 }
 0x195   : > { %1163 = vpow2.f32 %v673_v60  ;;  %v607_v53 = vsub.f32 %v1489_v5, %v562_v16  ;;  %v608_v24 = vsub.f32 %v1493_v9, %v562_v16  ;;  %v609_v12 = vsub.f32 %v1497_v15, %v565_v25 }
 0x196   : > { %1165 = vpow2.f32 %v675_v32  ;;  %v610_v48 = vsub.f32 %v1503_v21, %v565_v25  ;;  %v721_v5 = vunpack.c.2.s8 %v1610_v44  ;;  %v720_v9 = vunpack.c.1.s8 %v1619_v59 }
 0x197   : > { %1167 = vpow2.f32 %v669_v6  ;;  %v641_v35 = vmul.f32 1.442695, %v607_v53  ;;  %v643_v36 = vmul.f32 1.442695, %v608_v24  ;;  %v645_v38 = vmul.f32 1.442695, %v609_v12 }
 0x198   : > { %1169 = vpow2.f32 %v671_v14  ;;  %v647_v50 = vmul.f32 1.442695, %v610_v48  ;;  %v589_v0 = vpop.xlane.xlu0 %588  ;;  %v568_v29 = vpop.xlane.xlu1 %567  ;;  %v722_v32 = vunpack.c.2.s8 %v1619_v59  ;;  %v1675_v49 = vcvt.s32.f32 %v719_v30 }
 0x199   : > { %1171 = vpow2.f32 %v641_v35  ;;  %v625_v15 = vsub.f32 %v1500_v17, %v589_v0  ;;  %v626_v21 = vsub.f32 %v1506_v23, %v589_v0  ;;  %v611_v7 = vsub.f32 %v1513_v33, %v568_v29 }
 0x19a   : > { %1173 = vpow2.f32 %v643_v36  ;;  %v612_v6 = vsub.f32 %v1518_v39, %v568_v29  ;;  %v1680_v33 = vcvt.s32.f32 %v720_v9 }
 0x19b   : > { %v1160_v60 = vpop.eup %1159  ;;  %1175 = vpow2.f32 %v645_v38  ;;  %v677_v14 = vmul.f32 1.442695, %v625_v15  ;;  %v679_v16 = vmul.f32 1.442695, %v626_v21  ;;  %v649_v25 = vmul.f32 1.442695, %v611_v7 }
 0x19c   : > { %v1162_v53 = vpop.eup %1161  ;;  %1177 = vpow2.f32 %v647_v50  ;;  %v651_v24 = vmul.f32 1.442695, %v612_v6  ;;  %v592_v17 = vpop.xlane.xlu1 %591  ;;  %v1678_v23 = vmul.f32 %v1160_v60, %v1601_v34  ;;  %v735_v38 = vunpack.c.1.s8 %v1628_v11 }
 0x19d   : > { %v571_v12 = vpop.xlane.xlu0 %570  ;;  %1179 = vpow2.f32 %v677_v14  ;;  %v627_v39 = vsub.f32 %v1522_v43, %v592_v17  ;;  %v628_v48 = vsub.f32 %v1525_v46, %v592_v17  ;;  %v1687_v36 = vmul.f32 %v1162_v53, %v1603_v40 }
 0x19e   : > { %v613_v30 = vsub.f32 %v1529_v55, %v571_v12  ;;  %1181 = vpow2.f32 %v679_v16  ;;  %v614_v35 = vsub.f32 %v1533_v61, %v571_v12 }
 0x19f   : > { %v1164_v50 = vpop.eup %1163  ;;  %1183 = vpow2.f32 %v649_v25  ;;  %v681_v34 = vmul.f32 1.442695, %v627_v39  ;;  %v683_v0 = vmul.f32 1.442695, %v628_v48  ;;  %v805_v55 = vadd.f32 %v1687_v36, %v1678_v23 }
 0x1a0   : > { %v653_v29 = vmul.f32 1.442695, %v613_v30  ;;  %v1166_v9 = vpop.eup %1165  ;;  %1185 = vpow2.f32 %v651_v24  ;;  %v655_v43 = vmul.f32 1.442695, %v614_v35  ;;  %v574_v46 = vpop.xlane.xlu1 %573  ;;  %v1693_v61 = vmul.f32 %v1164_v50, %v1614_v57 }
 0x1a1   : > { %v595_v15 = vpop.xlane.xlu0 %594  ;;  %v1168_v40 = vpop.eup %1167  ;;  %1187 = vpow2.f32 %v681_v34  ;;  %v615_v6 = vsub.f32 %v1545_v13, %v574_v46  ;;  %v616_v14 = vsub.f32 %v1548_v20, %v574_v46  ;;  %806 = vadd.xlane.f32.xlu0 %v805_v55  ;;  %v1703_v25 = vmul.f32 %v1166_v9, %v1616_v58 }
 0x1a2   : > { %v629_v21 = vsub.f32 %v1535_v62, %v595_v15  ;;  %v630_v7 = vsub.f32 %v1538_v2, %v595_v15  ;;  %v1170_v60 = vpop.eup %1169  ;;  %1189 = vpow2.f32 %v683_v0  ;;  %v1700_v16 = vmul.f32 %v1168_v40, %v1605_v41 }
 0x1a3   : > { %v1172_v57 = vpop.eup %1171  ;;  %1191 = vpow2.f32 %v653_v29  ;;  %v657_v62 = vmul.f32 1.442695, %v615_v6  ;;  %v659_v2 = vmul.f32 1.442695, %v616_v14  ;;  %v1706_v12 = vmul.f32 %v1170_v60, %v1607_v42 }
 0x1a4   : > { %v685_v53 = vmul.f32 1.442695, %v629_v21  ;;  %v687_v24 = vmul.f32 1.442695, %v630_v7  ;;  %v1174_v17 = vpop.eup %1173  ;;  %1193 = vpow2.f32 %v655_v43  ;;  %v598_v13 = vpop.xlane.xlu1 %597  ;;  %v1709_v39 = vmul.f32 %v1172_v57, %v1625_v10 }
 0x1a5   : > { %v577_v20 = vpop.xlane.xlu0 %576  ;;  %v1176_v41 = vpop.eup %1175  ;;  %v631_v58 = vsub.f32 %v1552_v26, %v598_v13  ;;  %v632_v48 = vsub.f32 %v1557_v31, %v598_v13  ;;  %v829_v50 = vadd.f32 %v1706_v12, %v1700_v16  ;;  %v1724_v15 = vmul.f32 %v1174_v17, %v1630_v18 }
 0x1a6   : > { %1195 = vpow2.f32 %v685_v53  ;;  %v617_v30 = vsub.f32 %v1561_v37, %v577_v20  ;;  %v1178_v35 = vpop.eup %1177  ;;  %v618_v42 = vsub.f32 %v1565_v45, %v577_v20  ;;  %v1718_v34 = vmul.f32 %v1176_v41, %v1612_v56  ;;  %v1964_v53 = vld [vmem:[#allocation8_spill] sm:$0xff]  ;;  %v1966_v20 = vld [vmem:[#allocation7_spill] sm:$0xff] }
 0x1a7   : > { %1197 = vpow2.f32 %v687_v24  ;;  %v1180_v10 = vpop.eup %1179  ;;  %v689_v0 = vmul.f32 1.442695, %v631_v58  ;;  %v691_v29 = vmul.f32 1.442695, %v632_v48  ;;  %830 = vadd.xlane.f32.xlu0 %v829_v50  ;;  %v1721_v37 = vmul.f32 %v1178_v35, %v1623_v8 }
 0x1a8   : > { %1199 = vpow2.f32 %v657_v62  ;;  %v661_v9 = vmul.f32 1.442695, %v617_v30  ;;  %v1182_v26 = vpop.eup %1181  ;;  %v663_v31 = vmul.f32 1.442695, %v618_v42  ;;  %v580_v45 = vpop.xlane.xlu1 %579  ;;  %v808_v8 = vadd.f32 %v1724_v15, %v1709_v39  ;;  %v1967_v30 = vld [vmem:[#allocation9_spill] sm:$0xff] }
 0x1a9   : > { %1201 = vpow2.f32 %v659_v2  ;;  %v601_v43 = vpop.xlane.xlu0 %600  ;;  %v1184_v46 = vpop.eup %1183  ;;  %v619_v40 = vsub.f32 %v1577_v63, %v580_v45  ;;  %v811_v7 = vadd.f32 %v1721_v37, %v1718_v34  ;;  %v620_v18 = vsub.f32 %v1579_v3, %v580_v45  ;;  %v1965_v2 = vld [vmem:[#allocation6_spill] sm:$0xff] }
 0x1aa   : > { %1203 = vpow2.f32 %v689_v0  ;;  %v633_v56 = vsub.f32 %v1567_v47, %v601_v43  ;;  %v634_v55 = vsub.f32 %v1570_v54, %v601_v43  ;;  %v1186_v21 = vpop.eup %1185  ;;  %809 = vadd.xlane.f32.xlu1 %v808_v8  ;;  %v1735_v63 = vmul.f32 %v1180_v10, %v1632_v19 }
 0x1ab   : > { %1205 = vpow2.f32 %v691_v29  ;;  %v1188_v6 = vpop.eup %1187  ;;  %v665_v57 = vmul.f32 1.442695, %v619_v40  ;;  %812 = vadd.xlane.f32.xlu0 %v811_v7  ;;  %v667_v54 = vmul.f32 1.442695, %v620_v18  ;;  %v1738_v24 = vmul.f32 %v1182_v26, %v1964_v53 }
 0x1ac   : > { %1207 = vpow2.f32 %v661_v9  ;;  %v693_v60 = vmul.f32 1.442695, %v633_v56  ;;  %v695_v14 = vmul.f32 1.442695, %v634_v55  ;;  %v1190_v47 = vpop.eup %1189  ;;  %v604_v62 = vpop.xlane.xlu1 %603  ;;  %v832_v3 = vadd.f32 %v1703_v25, %v1693_v61 }
 0x1ad   : > { %1209 = vpow2.f32 %v663_v31  ;;  %v1192_v17 = vpop.eup %1191  ;;  %v635_v13 = vsub.f32 %v1965_v2, %v604_v62  ;;  %v636_v41 = vsub.f32 %v1966_v20, %v604_v62  ;;  %v835_v48 = vadd.f32 %v1738_v24, %v1735_v63 }
 0x1ae   : > { %1211 = vpow2.f32 %v693_v60  ;;  %v1194_v58 = vpop.eup %1193  ;;  %v1747_v19 = vmul.f32 %v1192_v17, %v1650_v27  ;;  %v1750_v35 = vmul.f32 %v1184_v46, %v1967_v30  ;;  %v737_v10 = vunpack.c.2.s8 %v1628_v11  ;;  %833 = vadd.xlane.f32.xlu1 %v832_v3  ;;  %v1968_v27 = vld [vmem:[#allocation10_spill] sm:$0xff] }
 0x1af   : > { %1213 = vpow2.f32 %v695_v14  ;;  %v1753_v42 = vmul.f32 %v1194_v58, %v1653_v22  ;;  %v738_v0 = vunpack.c.2.s8 %v1641_v51  ;;  %v736_v29 = vunpack.c.1.s8 %v1641_v51  ;;  %836 = vadd.xlane.f32.xlu0 %v835_v48 }
 0x1b0   : > { %v1196_v50 = vpop.eup %1195  ;;  %1215 = vpow2.f32 %v665_v57  ;;  %v697_v26 = vmul.f32 1.442695, %v635_v13  ;;  %v1759_v31 = vmul.f32 %v1186_v21, %v1968_v27  ;;  %v699_v22 = vmul.f32 1.442695, %v636_v41 }
 0x1b1   : > { %v1198_v9 = vpop.eup %1197  ;;  %v1762_v43 = vmul.f32 %v1196_v50, %v1655_v1  ;;  %1217 = vpow2.f32 %v667_v54  ;;  %v817_v46 = vadd.f32 %v1753_v42, %v1747_v19  ;;  %v1772_v7 = vmul.f32 %v1188_v6, %v1657_v4 }
 0x1b2   : > { %v1200_v45 = vpop.eup %1199  ;;  %v1767_v56 = vmul.f32 %v1198_v9, %v1665_v28  ;;  %v814_v40 = vadd.f32 %v1759_v31, %v1750_v35  ;;  %v1775_v21 = vmul.f32 %v1190_v47, %v1659_v52  ;;  %v753_v1 = vcvt.s32.f32 %v721_v5 }
 0x1b3   : > { %v1202_v55 = vpop.eup %1201  ;;  %v754_v18 = vcvt.s32.f32 %v722_v32  ;;  %v767_v28 = vcvt.s32.f32 %v735_v38  ;;  %1219 = vpow2.f32 %v697_v26  ;;  %818 = vadd.xlane.f32.xlu0 %v817_v46  ;;  %v769_v6 = vcvt.s32.f32 %v737_v10 }
 0x1b4   : > { %v1204_v8 = vpop.eup %1203  ;;  %815 = vadd.xlane.f32.xlu1 %v814_v40  ;;  %v841_v4 = vadd.f32 %v1767_v56, %v1762_v43  ;;  %v723_v52 = vunpack.c.3.s8 %v1610_v44  ;;  %1221 = vpow2.f32 %v699_v22  ;;  %v770_v5 = vcvt.s32.f32 %v738_v0 }
 0x1b5   : > { %v1206_v60 = vpop.eup %1205  ;;  %v768_v57 = vcvt.s32.f32 %v736_v29  ;;  %v724_v47 = vunpack.c.3.s8 %v1619_v59  ;;  %v838_v38 = vadd.f32 %v1775_v21, %v1772_v7  ;;  %v1792_v53 = vmul.f32 %v1200_v45, %v1675_v49 }
 0x1b6   : > { %v1208_v14 = vpop.eup %1207  ;;  %v1795_v62 = vmul.f32 %v1202_v55, %v1680_v33  ;;  %v755_v59 = vcvt.s32.f32 %v723_v52  ;;  %v739_v49 = vunpack.c.3.s8 %v1628_v11  ;;  %v1808_v48 = vmul.f32 %v1204_v8, %v767_v28 }
 0x1b7   : > { %v1210_v32 = vpop.eup %1209  ;;  %v1789_v54 = vmul.f32 %v1208_v14, %v753_v1  ;;  %842 = vadd.xlane.f32.xlu0 %v841_v4  ;;  %v756_v41 = vcvt.s32.f32 %v724_v47  ;;  %v1810_v30 = vmul.f32 %v1206_v60, %v768_v57  ;;  %v740_v50 = vunpack.c.3.s8 %v1641_v51 }
 0x1b8   : > { %v1212_v17 = vpop.eup %1211  ;;  %v1797_v44 = vmul.f32 %v1210_v32, %v754_v18  ;;  %839 = vadd.xlane.f32.xlu1 %v838_v38  ;;  %v820_v33 = vadd.f32 %v1795_v62, %v1792_v53  ;;  %v771_v29 = vcvt.s32.f32 %v739_v49 }
 0x1b9   : > { %v1214_v3 = vpop.eup %1213  ;;  %v1799_v2 = vmul.f32 %v1212_v17, %v769_v6  ;;  %v844_v11 = vadd.f32 %v1810_v30, %v1808_v48  ;;  %v772_v45 = vcvt.s32.f32 %v740_v50 }
 0x1ba   : > { %v823_v13 = vadd.f32 %v1797_v44, %v1789_v54  ;;  %v1803_v20 = vmul.f32 %v1214_v3, %v770_v5  ;;  %v1216_v58 = vpop.eup %1215 }
 0x1bb   : > { %v1218_v10 = vpop.eup %1217  ;;  %v1817_v26 = vmul.f32 %v1216_v58, %v755_v59 }
 0x1bc   : > { %824 = vadd.xlane.f32.xlu0 %v823_v13  ;;  %821 = vadd.xlane.f32.xlu1 %v820_v33  ;;  %v847_v0 = vadd.f32 %v1803_v20, %v1799_v2  ;;  %v1819_v27 = vmul.f32 %v1218_v10, %v756_v41 }
 0x1bd   : > { %v1220_v9 = vpop.eup %1219 }
 0x1be   : > { %v1222_v22 = vpop.eup %1221  ;;  %v826_v51 = vadd.f32 %v1819_v27, %v1817_v26  ;;  %v1823_v46 = vmul.f32 %v1220_v9, %v771_v29 }
 0x1bf   : > { %v1825_v55 = vmul.f32 %v1222_v22, %v772_v45 }
 0x1c0   : > { %848 = vadd.xlane.f32.xlu0 %v847_v0  ;;  %845 = vadd.xlane.f32.xlu1 %v844_v11 }
 0x1c1   : > { %v850_v40 = vadd.f32 %v1825_v55, %v1823_v46 }
 0x1c4   : > { %827 = vadd.xlane.f32.xlu1 %v826_v51 }
 0x1c8   : > { %851 = vadd.xlane.f32.xlu1 %v850_v40 }
 0x22e   : > { %v807_v1 = vpop.xlane.xlu0 %806 }
 0x22f   : > { %1223 = vrcp.f32 %v807_v1 }
 0x234   : > { %v831_v8 = vpop.xlane.xlu0 %830 }
 0x235   : > { %1225 = vrcp.f32 %v831_v8 }
 0x237   : > { %v810_v28 = vpop.xlane.xlu1 %809 }
 0x238   : > { %v813_v18 = vpop.xlane.xlu0 %812 }
 0x239   : > { %v1224_v60 = vpop.eup %1223  ;;  %1227 = vrcp.f32 %v813_v18 }
 0x23a   : > { %v885_v4 = vmul.f32 %v1224_v60, %v1678_v23  ;;  %v886_v6 = vmul.f32 %v1224_v60, %v1687_v36  ;;  %1229 = vrcp.f32 %v810_v28 }
 0x23b   : > { %v834_v57 = vpop.xlane.xlu1 %833 }
 0x23c   : > { %v917_v52 = vadd.f32 1e-10, %v885_v4  ;;  %v918_v14 = vadd.f32 1e-10, %v886_v6  ;;  %v837_v5 = vpop.xlane.xlu0 %836 }
 0x23d   : > { %1231 = vrcp.f32 %v837_v5 }
 0x23e   : > { %949 = vst [vmem:[%s1834_s13] sm:$0xff] %v917_v52  ;;  %950 = vst [vmem:[%s1834_s13 + $0x8] sm:$0xff] %v918_v14  ;;  %1233 = vrcp.f32 %v834_v57 }
 0x23f   : > { %v1226_v47 = vpop.eup %1225 }
 0x240   : > { %v901_v23 = vmul.f32 %v1226_v47, %v1700_v16  ;;  %v902_v36 = vmul.f32 %v1226_v47, %v1706_v12  ;;  %v819_v32 = vpop.xlane.xlu0 %818 }
 0x241   : > { %v816_v38 = vpop.xlane.xlu1 %815  ;;  %1235 = vrcp.f32 %v819_v32 }
 0x242   : > { %v933_v17 = vadd.f32 1e-10, %v901_v23  ;;  %v934_v3 = vadd.f32 1e-10, %v902_v36  ;;  %1237 = vrcp.f32 %v816_v38 }
 0x243   : > { %v1228_v59 = vpop.eup %1227 }
 0x244   : > { %v1230_v13 = vpop.eup %1229  ;;  %965 = vst [vmem:[%s1834_s13 + $0x80] sm:$0xff] %v933_v17  ;;  %966 = vst [vmem:[%s1834_s13 + $0x88] sm:$0xff] %v934_v3  ;;  %v889_v41 = vmul.f32 %v1228_v59, %v1718_v34  ;;  %v890_v49 = vmul.f32 %v1228_v59, %v1721_v37  ;;  %v843_v58 = vpop.xlane.xlu0 %842 }
 0x245   : > { %v840_v16 = vpop.xlane.xlu1 %839  ;;  %v887_v12 = vmul.f32 %v1230_v13, %v1709_v39  ;;  %v888_v33 = vmul.f32 %v1230_v13, %v1724_v15  ;;  %1239 = vrcp.f32 %v843_v58 }
 0x246   : > { %v921_v50 = vadd.f32 1e-10, %v889_v41  ;;  %v922_v10 = vadd.f32 1e-10, %v890_v49  ;;  %1241 = vrcp.f32 %v840_v16 }
 0x247   : > { %v1232_v0 = vpop.eup %1231  ;;  %v919_v29 = vadd.f32 1e-10, %v887_v12  ;;  %v920_v9 = vadd.f32 1e-10, %v888_v33 }
 0x248   : > { %v1234_v11 = vpop.eup %1233  ;;  %953 = vst [vmem:[%s1834_s13 + $0x20] sm:$0xff] %v921_v50  ;;  %954 = vst [vmem:[%s1834_s13 + $0x28] sm:$0xff] %v922_v10  ;;  %v905_v34 = vmul.f32 %v1232_v0, %v1735_v63  ;;  %v906_v37 = vmul.f32 %v1232_v0, %v1738_v24 }
 0x249   : > { %v825_v39 = vpop.xlane.xlu0 %824  ;;  %v822_v45 = vpop.xlane.xlu1 %821  ;;  %951 = vst [vmem:[%s1834_s13 + $0x10] sm:$0xff] %v919_v29  ;;  %952 = vst [vmem:[%s1834_s13 + $0x18] sm:$0xff] %v920_v9  ;;  %v903_v15 = vmul.f32 %v1234_v11, %v1693_v61  ;;  %v904_v22 = vmul.f32 %v1234_v11, %v1703_v25 }
 0x24a   : > { %1243 = vrcp.f32 %v825_v39  ;;  %v937_v51 = vadd.f32 1e-10, %v905_v34  ;;  %v938_v40 = vadd.f32 1e-10, %v906_v37 }
 0x24b   : > { %1245 = vrcp.f32 %v822_v45  ;;  %v1236_v1 = vpop.eup %1235  ;;  %v935_v63 = vadd.f32 1e-10, %v903_v15  ;;  %v936_v8 = vadd.f32 1e-10, %v904_v22 }
 0x24c   : > { %v1238_v18 = vpop.eup %1237  ;;  %969 = vst [vmem:[%s1834_s13 + $0xa0] sm:$0xff] %v937_v51  ;;  %970 = vst [vmem:[%s1834_s13 + $0xa8] sm:$0xff] %v938_v40  ;;  %v893_v24 = vmul.f32 %v1236_v1, %v1747_v19  ;;  %v894_v28 = vmul.f32 %v1236_v1, %v1753_v42 }
 0x24d   : > { %v849_v61 = vpop.xlane.xlu0 %848  ;;  %v846_v60 = vpop.xlane.xlu1 %845  ;;  %967 = vst [vmem:[%s1834_s13 + $0x90] sm:$0xff] %v935_v63  ;;  %968 = vst [vmem:[%s1834_s13 + $0x98] sm:$0xff] %v936_v8  ;;  %v891_v25 = vmul.f32 %v1238_v18, %v1750_v35  ;;  %v892_v4 = vmul.f32 %v1238_v18, %v1759_v31 }
 0x24e   : > { %1247 = vrcp.f32 %v849_v61  ;;  %v925_v6 = vadd.f32 1e-10, %v893_v24  ;;  %v926_v52 = vadd.f32 1e-10, %v894_v28 }
 0x24f   : > { %1249 = vrcp.f32 %v846_v60  ;;  %v1240_v14 = vpop.eup %1239  ;;  %v923_v19 = vadd.f32 1e-10, %v891_v25  ;;  %v924_v5 = vadd.f32 1e-10, %v892_v4 }
 0x250   : > { %v1242_v57 = vpop.eup %1241  ;;  %957 = vst [vmem:[%s1834_s13 + $0x40] sm:$0xff] %v925_v6  ;;  %958 = vst [vmem:[%s1834_s13 + $0x48] sm:$0xff] %v926_v52  ;;  %v909_v42 = vmul.f32 %v1240_v14, %v1762_v43  ;;  %v910_v47 = vmul.f32 %v1240_v14, %v1767_v56 }
 0x251   : > { %v828_v35 = vpop.xlane.xlu1 %827  ;;  %955 = vst [vmem:[%s1834_s13 + $0x30] sm:$0xff] %v923_v19  ;;  %956 = vst [vmem:[%s1834_s13 + $0x38] sm:$0xff] %v924_v5  ;;  %v907_v31 = vmul.f32 %v1242_v57, %v1772_v7  ;;  %v908_v23 = vmul.f32 %v1242_v57, %v1775_v21 }
 0x252   : > { %1251 = vrcp.f32 %v828_v35  ;;  %v941_v36 = vadd.f32 1e-10, %v909_v42  ;;  %v942_v32 = vadd.f32 1e-10, %v910_v47 }
 0x253   : > { %v939_v17 = vadd.f32 1e-10, %v907_v31  ;;  %v940_v3 = vadd.f32 1e-10, %v908_v23 }
 0x254   : > { %v1244_v38 = vpop.eup %1243  ;;  %973 = vst [vmem:[%s1834_s13 + $0xc0] sm:$0xff] %v941_v36  ;;  %974 = vst [vmem:[%s1834_s13 + $0xc8] sm:$0xff] %v942_v32 }
 0x255   : > { %v1246_v59 = vpop.eup %1245  ;;  %v897_v43 = vmul.f32 %v1244_v38, %v1789_v54  ;;  %v898_v56 = vmul.f32 %v1244_v38, %v1797_v44  ;;  %v852_v13 = vpop.xlane.xlu1 %851  ;;  %971 = vst [vmem:[%s1834_s13 + $0xb0] sm:$0xff] %v939_v17  ;;  %972 = vst [vmem:[%s1834_s13 + $0xb8] sm:$0xff] %v940_v3 }
 0x256   : > { %v895_v7 = vmul.f32 %v1246_v59, %v1792_v53  ;;  %v896_v21 = vmul.f32 %v1246_v59, %v1795_v62  ;;  %1253 = vrcp.f32 %v852_v13 }
 0x257   : > { %v929_v41 = vadd.f32 1e-10, %v897_v43  ;;  %v930_v49 = vadd.f32 1e-10, %v898_v56 }
 0x258   : > { %v1248_v58 = vpop.eup %1247  ;;  %v927_v16 = vadd.f32 1e-10, %v895_v7  ;;  %v928_v12 = vadd.f32 1e-10, %v896_v21 }
 0x259   : > { %v1250_v54 = vpop.eup %1249  ;;  %961 = vst [vmem:[%s1834_s13 + $0x60] sm:$0xff] %v929_v41  ;;  %962 = vst [vmem:[%s1834_s13 + $0x68] sm:$0xff] %v930_v49  ;;  %v913_v44 = vmul.f32 %v1248_v58, %v1799_v2  ;;  %v914_v33 = vmul.f32 %v1248_v58, %v1803_v20 }
 0x25a   : > { %959 = vst [vmem:[%s1834_s13 + $0x50] sm:$0xff] %v927_v16  ;;  %960 = vst [vmem:[%s1834_s13 + $0x58] sm:$0xff] %v928_v12  ;;  %v911_v53 = vmul.f32 %v1250_v54, %v1808_v48  ;;  %v912_v62 = vmul.f32 %v1250_v54, %v1810_v30 }
 0x25b   : > { %v945_v50 = vadd.f32 1e-10, %v913_v44  ;;  %v946_v10 = vadd.f32 1e-10, %v914_v33 }
 0x25c   : > { %v1252_v0 = vpop.eup %1251  ;;  %v943_v29 = vadd.f32 1e-10, %v911_v53  ;;  %v944_v9 = vadd.f32 1e-10, %v912_v62 }
 0x25d   : > { %977 = vst [vmem:[%s1834_s13 + $0xe0] sm:$0xff] %v945_v50  ;;  %978 = vst [vmem:[%s1834_s13 + $0xe8] sm:$0xff] %v946_v10  ;;  %v899_v2 = vmul.f32 %v1252_v0, %v1817_v26  ;;  %v900_v20 = vmul.f32 %v1252_v0, %v1819_v27 }
 0x25e   : > { %975 = vst [vmem:[%s1834_s13 + $0xd0] sm:$0xff] %v943_v29  ;;  %976 = vst [vmem:[%s1834_s13 + $0xd8] sm:$0xff] %v944_v9 }
 0x25f   : > { %v931_v48 = vadd.f32 1e-10, %v899_v2  ;;  %v932_v30 = vadd.f32 1e-10, %v900_v20 }
 0x260   : > { %v1254_v11 = vpop.eup %1253 }
 0x261   : > { %963 = vst [vmem:[%s1834_s13 + $0x70] sm:$0xff] %v931_v48  ;;  %964 = vst [vmem:[%s1834_s13 + $0x78] sm:$0xff] %v932_v30  ;;  %v915_v34 = vmul.f32 %v1254_v11, %v1823_v46  ;;  %v916_v37 = vmul.f32 %v1254_v11, %v1825_v55 }
 0x263   : > { %v947_v26 = vadd.f32 1e-10, %v915_v34  ;;  %v948_v27 = vadd.f32 1e-10, %v916_v37 }
 0x265   : > { %979 = vst [vmem:[%s1834_s13 + $0xf0] sm:$0xff] %v947_v26  ;;  %980 = vst [vmem:[%s1834_s13 + $0xf8] sm:$0xff] %v948_v27 }
 0x266   : > { %1268 = shalt.err (!%p1265_p4)
}
 0x267   : > { %s1269_s5 = scalar_lea.hbm %s1901_s23, 4096  ;;  %s1273_s8 = scalar_lea.hbm %s1954_s4, 8192 }
 0x268   : > { %p1270_p7 = scmp.ne.s32.totalorder %s1901_s23, %s1269_s5  ;;  %p1274_p10 = scmp.lt.u32.totalorder %s1901_s23, %s1954_s4 }
 0x269   : > { %p1275_p11 = scmp.lt.u32.totalorder %s1273_s8, %s1269_s5  ;;  %p1277_p13 = scmp.lt.u32.totalorder %s1269_s5, %s1901_s23 }
 0x26a   : > { %p1271_p8 = pnand %p1270_p7, %p1389_p5 }
 0x26b   : > { %p1276_p12 = por %p1275_p11, %p1274_p10 }
 0x26c   : > { %p1272_p9 = pneg %p1271_p8 }
 0x26d   : > { %p1278_p0 = por %p1277_p13, %p1276_p12 }
 0x26f   : > { %p1279_p1 = pnand %p1278_p0, %p1272_p9 }
 0x271   : > { %1282 = shalt.err (!%p1279_p1)
}
 0x272   : > { %s1321_s11 = smov 256   ;;  %s1322_s12 = smov 16  }
 0x273   : > { %1117 = dma.vmem_to_hbm [thread:$0]  (%p1389_p5), %s1903_s15, 4096, %s1901_s23, %s1909_s0, %s1321_s11, %s1321_s11, %s1322_s12  }
 0x274 PF: > { %p1123_p2 = scmp.ge.s32.totalorder %s1317_s20, 2  ;;  %s1011_s13 = sand.u32 1, %s1305_s17  }
 0x275   : > { %s1012_s14 = scalar_lea.sflag [#allocation4], %s1011_s13 }
 0x276   : > { %p1120_p3 = pnand %p1123_p2, %p1393_p6 }
 0x278   : > { %1300 = dma.done.wait (!%p1120_p3), %s1012_s14, 4096  }
 0x279   : > { %1302 = vsyncadd (!%p1120_p3), %s1012_s14, 4294963200  ;;  %p15_p4 = scmp.ge.s32.totalorder %s1376_s22, 4   ;;  %s1969_s17 = smov %s1309_s18 }
 0x27a   : > { %s1970_s18 = smov %s1313_s19  ;;  %s1971_s19 = smov %s1387_s25 }
 0x27b   : > { %s1972_s20 = smov %s1376_s22  ;;  %17 = sbr.rel (!%p15_p4) target bundleno = 5 (0x5), region = 74 }
 0x282   :  { %1017 = vsyncpa [#allocation4], 1 }
 0x283   :  { %1019 = vsyncpa [#allocation4 + $0x1], 1 }

</bundles_post_ra>
